<compile_context>
chip_gen: v7x
topology: tpu7x:2x2x1
jax: 0.10.0
libtpu: 0.0.40
codegen_flags: <defaults>
</compile_context>

<pallas_src>
import jax
import jax.numpy as jnp
from jax.experimental import pallas as pl
from jax.experimental.pallas import tpu as pltpu

LANES = 128
MAX_TILE_ROWS = 2048  # (2048,128) f32 = 1 MiB; 2 in x 2 buf + 2 scratch ~= 6 MiB VMEM
NUM_SLICES = 2        # leading "parallel" grid axis (v7x megacore split)
EPS = 1e-5


def _round_up(x, m):
    return (x + m - 1) // m * m


def _make_kernel(rows, tile_rows, n_per_slice, need_mask):
    def kernel(pre_ref, tar_ref, inter_ref, union_ref, inter_acc, union_acc):
        s = pl.program_id(0)
        i = pl.program_id(1)

        @pl.when(i == 0)
        def _():
            inter_acc[...] = jnp.zeros_like(inter_acc)
            union_acc[...] = jnp.zeros_like(union_acc)

        p = pre_ref[...]
        t = tar_ref[...]
        if need_mask:
            # Mask rows past the real row count (partial last tile and the
            # clamped/redundant tiles of the last slice).
            row0 = (s * n_per_slice + i) * tile_rows
            rid = row0 + jax.lax.broadcasted_iota(jnp.int32, (tile_rows, LANES), 0)
            valid = rid < rows
            p = jnp.where(valid, p, 0.0)
            t = jnp.where(valid, t, 0.0)

        # Raw (unscaled) element-wise partial sums into VMEM-resident full-tile
        # accumulators (pure VPU work, memory-bound regime).
        inter_acc[...] += p * t
        union_acc[...] += p + t

        # Finalize once per slice: cross-sublane reduce to a (1, 128) partial
        # sum so only ~1 KiB per slice goes back to HBM.
        @pl.when(i == pl.num_programs(1) - 1)
        def _():
            inter_ref[...] = jnp.sum(inter_acc[...], axis=0, keepdims=True)
            union_ref[...] = jnp.sum(union_acc[...], axis=0, keepdims=True)

    return kernel


@jax.jit
def dice_loss(predict, target):
    assert predict.shape == target.shape, (
        "the size of predict and target must be equal."
    )
    pre = jnp.ravel(predict).astype(jnp.float32)
    tar = jnp.ravel(target).astype(jnp.float32)
    total = pre.size
    rows = total // LANES
    rem = total - rows * LANES
    main = rows * LANES

    if rows == 0:
        # Tiny input: no lane-aligned main part, just do it in plain JAX.
        inter_sum = jnp.sum(pre * tar)
        union_sum = jnp.sum(pre + tar)
    else:
        # Pure reshape (no pad) for the lane-aligned part.
        pre2d = (pre if rem == 0 else pre[:main]).reshape(rows, LANES)
        tar2d = (tar if rem == 0 else tar[:main]).reshape(rows, LANES)

        tile_rows = min(MAX_TILE_ROWS, _round_up(rows, 8))
        n_tiles = pl.cdiv(rows, tile_rows)
        num_slices = NUM_SLICES if n_tiles >= NUM_SLICES else 1
        n_per_slice = pl.cdiv(n_tiles, num_slices)
        # Masking only needed if the tile grid over-covers the real rows.
        need_mask = (num_slices * n_per_slice * tile_rows) != rows

        def in_map(s, i):
            idx = s * n_per_slice + i
            # Clamp redundant (fully-masked) tiles of the last slice onto a
            # valid block so no block index points outside the array.
            return (jnp.minimum(idx, n_tiles - 1), 0)

        out_map = lambda s, i: (s, 0, 0)

        kernel = _make_kernel(rows, tile_rows, n_per_slice, need_mask)

        part_shape = jax.ShapeDtypeStruct((num_slices, 1, LANES), jnp.float32)
        cost = pl.CostEstimate(
            flops=3 * main,
            transcendentals=0,
            bytes_accessed=2 * main * 4 + 2 * num_slices * LANES * 4,
        )

        inter_parts, union_parts = pl.pallas_call(
            kernel,
            out_shape=(part_shape, part_shape),
            grid_spec=pltpu.PrefetchScalarGridSpec(
                num_scalar_prefetch=0,
                grid=(num_slices, n_per_slice),
                in_specs=[
                    pl.BlockSpec((tile_rows, LANES), in_map),
                    pl.BlockSpec((tile_rows, LANES), in_map),
                ],
                out_specs=[
                    pl.BlockSpec((None, 1, LANES), out_map),
                    pl.BlockSpec((None, 1, LANES), out_map),
                ],
                scratch_shapes=[
                    pltpu.VMEM((tile_rows, LANES), jnp.float32),
                    pltpu.VMEM((tile_rows, LANES), jnp.float32),
                ],
            ),
            compiler_params=pltpu.CompilerParams(
                dimension_semantics=("parallel", "arbitrary")
            ),
            cost_estimate=cost,
        )(pre2d, tar2d)

        inter_sum = jnp.sum(inter_parts)
        union_sum = jnp.sum(union_parts)

        if rem:
            # Non-128-multiple tail (< 128 elements): plain JAX, sum-neutral.
            tp = pre[main:]
            tt = tar[main:]
            inter_sum = inter_sum + jnp.sum(tp * tt)
            union_sum = union_sum + jnp.sum(tp + tt)

    intersection = inter_sum * jnp.float32(1.0 / (255.0 * 255.0))
    union = union_sum * jnp.float32(1.0 / 255.0)
    return 1.0 - 2.0 * (intersection + EPS) / (union + EPS)


def dice_loss_ref(predict, target):
    num = predict.shape[0]
    pre = predict.reshape(num, -1).astype(jnp.float32)
    tar = target.reshape(num, -1).astype(jnp.float32)
    intersection = (pre / 255 * tar / 255).sum(-1).sum()
    union = (pre / 255).sum(-1).sum() + (tar / 255).sum(-1).sum()
    return 1 - 2 * (intersection + EPS) / (union + EPS)


if __name__ == "__main__":
    key = jax.random.PRNGKey(0)
    k1, k2 = jax.random.split(key)
    # Small NCHW shapes (masks scaled in [0, 255]).
    predict = jax.random.uniform(k1, (2, 4, 16, 16), jnp.float32) * 255.0
    target = jax.random.uniform(k2, (2, 4, 16, 16), jnp.float32) * 255.0

    score = dice_loss(predict, target)
    jax.block_until_ready(score)

    ref = dice_loss_ref(predict, target)
    assert jnp.allclose(score, ref, atol=1e-5, rtol=1e-5), (score, ref)
    print("KERNEL_OK")
</pallas_src>

<mosaic_0001>
module attributes {stable_mosaic.version = 11 : i64} {
  func.func @kernel(%arg0: i32, %arg1: i32, %arg2: memref<16x128xf32, #tpu.memory_space<vmem>>, %arg3: memref<16x128xf32, #tpu.memory_space<vmem>>, %arg4: memref<1x1x128xf32, #tpu.memory_space<vmem>>, %arg5: memref<1x1x128xf32, #tpu.memory_space<vmem>>, %arg6: memref<16x128xf32, #tpu.memory_space<vmem>>, %arg7: memref<16x128xf32, #tpu.memory_space<vmem>>) attributes {dimension_semantics = [#tpu.dimension_semantics<parallel>, #tpu.dimension_semantics<arbitrary>], iteration_bounds = array<i64: 1, 1>, scalar_prefetch = 0 : i64, scratch_operands = 2 : i64, tpu.core_type = #tpu.core_type<tc>, window_params = [{transform_indices = @transform_0, window_bounds = array<i64: 16, 128>}, {transform_indices = @transform_1, window_bounds = array<i64: 16, 128>}, {transform_indices = @transform_2, window_bounds = array<i64: 1, 1, 128>}, {transform_indices = @transform_3, window_bounds = array<i64: 1, 1, 128>}]} {
    %c0_i32 = arith.constant 0 : i32
    %0 = arith.cmpi eq, %arg1, %c0_i32 : i32
    %1 = arith.extui %0 : i1 to i32
    %c0_i32_0 = arith.constant 0 : i32
    %2 = arith.cmpi ne, %1, %c0_i32_0 : i32
    scf.if %2 {
      %cst = arith.constant 0.000000e+00 : f32
      %16 = vector.broadcast %cst : f32 to vector<16x128xf32>
      %c0_14 = arith.constant 0 : index
      %c0_15 = arith.constant 0 : index
      %17 = vector.load %arg6[%c0_14, %c0_15] : memref<16x128xf32, #tpu.memory_space<vmem>>, vector<16x128xf32>
      tpu.vector_store %arg6[%c0_14, %c0_15], %16 {strides = array<i32>} : memref<16x128xf32, #tpu.memory_space<vmem>>, vector<16x128xf32>,
      %cst_16 = arith.constant 0.000000e+00 : f32
      %18 = vector.broadcast %cst_16 : f32 to vector<16x128xf32>
      %c0_17 = arith.constant 0 : index
      %c0_18 = arith.constant 0 : index
      %19 = vector.load %arg7[%c0_17, %c0_18] : memref<16x128xf32, #tpu.memory_space<vmem>>, vector<16x128xf32>
      tpu.vector_store %arg7[%c0_17, %c0_18], %18 {strides = array<i32>} : memref<16x128xf32, #tpu.memory_space<vmem>>, vector<16x128xf32>,
    } else {
    }
    %c0 = arith.constant 0 : index
    %c0_1 = arith.constant 0 : index
    %3 = vector.load %arg2[%c0, %c0_1] : memref<16x128xf32, #tpu.memory_space<vmem>>, vector<16x128xf32>
    %c0_2 = arith.constant 0 : index
    %c0_3 = arith.constant 0 : index
    %4 = vector.load %arg3[%c0_2, %c0_3] : memref<16x128xf32, #tpu.memory_space<vmem>>, vector<16x128xf32>
    %c0_4 = arith.constant 0 : index
    %c0_5 = arith.constant 0 : index
    %5 = vector.load %arg6[%c0_4, %c0_5] : memref<16x128xf32, #tpu.memory_space<vmem>>, vector<16x128xf32>
    %6 = arith.mulf %3, %4 : vector<16x128xf32>
    %7 = arith.addf %5, %6 : vector<16x128xf32>
    %c0_6 = arith.constant 0 : index
    %c0_7 = arith.constant 0 : index
    %8 = vector.load %arg6[%c0_6, %c0_7] : memref<16x128xf32, #tpu.memory_space<vmem>>, vector<16x128xf32>
    tpu.vector_store %arg6[%c0_6, %c0_7], %7 {strides = array<i32>} : memref<16x128xf32, #tpu.memory_space<vmem>>, vector<16x128xf32>,
    %c0_8 = arith.constant 0 : index
    %c0_9 = arith.constant 0 : index
    %9 = vector.load %arg7[%c0_8, %c0_9] : memref<16x128xf32, #tpu.memory_space<vmem>>, vector<16x128xf32>
    %10 = arith.addf %3, %4 : vector<16x128xf32>
    %11 = arith.addf %9, %10 : vector<16x128xf32>
    %c0_10 = arith.constant 0 : index
    %c0_11 = arith.constant 0 : index
    %12 = vector.load %arg7[%c0_10, %c0_11] : memref<16x128xf32, #tpu.memory_space<vmem>>, vector<16x128xf32>
    tpu.vector_store %arg7[%c0_10, %c0_11], %11 {strides = array<i32>} : memref<16x128xf32, #tpu.memory_space<vmem>>, vector<16x128xf32>,
    %c0_i32_12 = arith.constant 0 : i32
    %13 = arith.cmpi eq, %arg1, %c0_i32_12 : i32
    %14 = arith.extui %13 : i1 to i32
    %c0_i32_13 = arith.constant 0 : i32
    %15 = arith.cmpi ne, %14, %c0_i32_13 : i32
    scf.if %15 {
      %c0_14 = arith.constant 0 : index
      %c0_15 = arith.constant 0 : index
      %16 = vector.load %arg6[%c0_14, %c0_15] : memref<16x128xf32, #tpu.memory_space<vmem>>, vector<16x128xf32>
      %cst = arith.constant dense<0.000000e+00> : vector<128xf32>
      %17 = vector.multi_reduction <add>, %16, %cst [0] : vector<16x128xf32> to vector<128xf32>
      %18 = vector.shape_cast %17 : vector<128xf32> to vector<1x128xf32>
      %c0_16 = arith.constant 0 : index
      %c0_17 = arith.constant 0 : index
      %c0_18 = arith.constant 0 : index
      %19 = vector.load %arg4[%c0_16, %c0_17, %c0_18] : memref<1x1x128xf32, #tpu.memory_space<vmem>>, vector<1x1x128xf32>
      %20 = vector.shape_cast %19 : vector<1x1x128xf32> to vector<1x128xf32>
      %21 = vector.shape_cast %18 : vector<1x128xf32> to vector<1x1x128xf32>
      tpu.vector_store %arg4[%c0_16, %c0_17, %c0_18], %21 {strides = array<i32>} : memref<1x1x128xf32, #tpu.memory_space<vmem>>, vector<1x1x128xf32>,
      %c0_19 = arith.constant 0 : index
      %c0_20 = arith.constant 0 : index
      %22 = vector.load %arg7[%c0_19, %c0_20] : memref<16x128xf32, #tpu.memory_space<vmem>>, vector<16x128xf32>
      %cst_21 = arith.constant dense<0.000000e+00> : vector<128xf32>
      %23 = vector.multi_reduction <add>, %22, %cst_21 [0] : vector<16x128xf32> to vector<128xf32>
      %24 = vector.shape_cast %23 : vector<128xf32> to vector<1x128xf32>
      %c0_22 = arith.constant 0 : index
      %c0_23 = arith.constant 0 : index
      %c0_24 = arith.constant 0 : index
      %25 = vector.load %arg5[%c0_22, %c0_23, %c0_24] : memref<1x1x128xf32, #tpu.memory_space<vmem>>, vector<1x1x128xf32>
      %26 = vector.shape_cast %25 : vector<1x1x128xf32> to vector<1x128xf32>
      %27 = vector.shape_cast %24 : vector<1x128xf32> to vector<1x1x128xf32>
      tpu.vector_store %arg5[%c0_22, %c0_23, %c0_24], %27 {strides = array<i32>} : memref<1x1x128xf32, #tpu.memory_space<vmem>>, vector<1x1x128xf32>,
    } else {
    }
    return
  }
  func.func @transform_0(%arg0: i32, %arg1: i32) -> (i32, i32) {
    %c1_i32 = arith.constant 1 : i32
    %0 = arith.muli %arg0, %c1_i32 : i32
    %1 = arith.addi %0, %arg1 : i32
    %c0_i32 = arith.constant 0 : i32
    %2 = arith.minsi %1, %c0_i32 : i32
    %c0_i32_0 = arith.constant 0 : i32
    %c0_i32_1 = arith.constant 0 : i32
    return %2, %c0_i32_0 : i32, i32
  }
  func.func @transform_1(%arg0: i32, %arg1: i32) -> (i32, i32) {
    %c1_i32 = arith.constant 1 : i32
    %0 = arith.muli %arg0, %c1_i32 : i32
    %1 = arith.addi %0, %arg1 : i32
    %c0_i32 = arith.constant 0 : i32
    %2 = arith.minsi %1, %c0_i32 : i32
    %c0_i32_0 = arith.constant 0 : i32
    %c0_i32_1 = arith.constant 0 : i32
    return %2, %c0_i32_0 : i32, i32
  }
  func.func @transform_2(%arg0: i32, %arg1: i32) -> (i32, i32, i32) {
    %c0_i32 = arith.constant 0 : i32
    %c0_i32_0 = arith.constant 0 : i32
    %c0_i32_1 = arith.constant 0 : i32
    return %arg0, %c0_i32, %c0_i32_0 : i32, i32, i32
  }
  func.func @transform_3(%arg0: i32, %arg1: i32) -> (i32, i32, i32) {
    %c0_i32 = arith.constant 0 : i32
    %c0_i32_0 = arith.constant 0 : i32
    %c0_i32_1 = arith.constant 0 : i32
    return %arg0, %c0_i32, %c0_i32_0 : i32, i32, i32
  }
}

</mosaic_0001>

<bundles_post_ra>
// kernel: dice_loss.1
= control target key start
LH: loop header
LB: loop body
LE: loop exit
PB: predicated region body
PF: predicated region fallthrough
CT: control target
= control target key end

     0   :  { %s186_s0 = inlined_call_operand.vmem [shape: f32[16,128], index: 0, kind: input, shape index: {}]   ;;  %s187_s1 = inlined_call_operand.vmem [shape: f32[16,128], index: 1, kind: input, shape index: {}]   ;;  %s188_s2 = inlined_call_operand.vmem [shape: f32[1,1,128], index: 2, kind: output, shape index: {0}]   ;;  %s189_s3 = inlined_call_operand.vmem [shape: f32[1,1,128], index: 3, kind: output, shape index: {1}]  }
   0x1   :  { %v85_v0 = vld [vmem:[%s186_s0] sm:$0xff]  ;;  %v86_v1 = vld [vmem:[%s186_s0 + $0x8] sm:$0xff] }
   0x2   :  { %v87_v2 = vld [vmem:[%s187_s1] sm:$0xff]  ;;  %v88_v3 = vld [vmem:[%s187_s1 + $0x8] sm:$0xff] }
   0x3   :  { %v91_v4 = vmul.f32 %v87_v2, %v85_v0  ;;  %v99_v5 = vadd.f32 %v87_v2, %v85_v0  ;;  %v92_v6 = vmul.f32 %v88_v3, %v86_v1  ;;  %v100_v7 = vadd.f32 %v88_v3, %v86_v1 }
   0x5   :  { %v110_v8 = vadd.f32 %v92_v6, %v91_v4  ;;  %v120_v9 = vadd.f32 %v100_v7, %v99_v5 }
   0x7   :  { %v111_v10 = vrot.slane %v110_v8, 4  ;;  %v121_v11 = vrot.slane %v120_v9, 4 }
   0x9   :  { %v112_v12 = vadd.f32 %v111_v10, %v110_v8  ;;  %v122_v13 = vadd.f32 %v121_v11, %v120_v9 }
   0xb   :  { %v113_v14 = vrot.slane %v112_v12, 2  ;;  %v123_v15 = vrot.slane %v122_v13, 2 }
   0xd   :  { %v114_v16 = vadd.f32 %v113_v14, %v112_v12  ;;  %v124_v17 = vadd.f32 %v123_v15, %v122_v13 }
   0xf   :  { %v115_v18 = vrot.slane %v114_v16, 1  ;;  %v125_v19 = vrot.slane %v124_v17, 1 }
  0x11   :  { %v116_v20 = vadd.f32 %v115_v18, %v114_v16  ;;  %v126_v21 = vadd.f32 %v125_v19, %v124_v17 }
  0x13   :  { %117 = vst [vmem:[%s188_s2] sm:$0x1] %v116_v20  ;;  %127 = vst [vmem:[%s189_s3] sm:$0x1] %v126_v21 }

</bundles_post_ra>
